<compile_context>
chip_gen: v7x
topology: tpu7x:2x2x1
jax: 0.10.0
libtpu: 0.0.40
codegen_flags: <defaults>
</compile_context>

<pallas_src>
import jax
import jax.numpy as jnp
from jax.experimental import pallas as pl
from jax.experimental.pallas import tpu as pltpu


def _round_up(x, m):
    return ((x + m - 1) // m) * m


def _pad2(w, rows, cols):
    r, c = w.shape
    return jnp.pad(w, ((0, rows - r), (0, cols - c)))


# -----------------------------------------------------------------------------
# y = x @ w + b with the activation slab X fully VMEM-resident (single M block,
# Buffered(1)) and the grid only over lane-dense 128-wide N tiles of W.
# -----------------------------------------------------------------------------

def _linear_kernel(x_ref, w_ref, b_ref, o_ref):
    o_ref[...] = (
        jnp.dot(x_ref[...], w_ref[...], preferred_element_type=jnp.float32)
        + b_ref[...]
    ).astype(o_ref.dtype)


def linear_xresident(x, w, b, *, tn=128, out_dtype=jnp.float32):
    """x:[M,K] (kept resident), w:[K,N], b:[N] or [1,N] -> [M,N] in out_dtype."""
    M, K = x.shape
    N = w.shape[1]
    b = jnp.asarray(b, jnp.float32).reshape(1, N)
    m_sub = 16 if x.dtype == jnp.bfloat16 else 8
    Mp = _round_up(M, m_sub)
    Np = _round_up(N, tn)
    xp = jnp.pad(x, ((0, Mp - M), (0, 0))) if Mp != M else x
    wp = jnp.pad(w, ((0, 0), (0, Np - N))) if Np != N else w
    bp = jnp.pad(b, ((0, 0), (0, Np - N))) if Np != N else b

    # TODO(synk): for very large M (huge T*B) the resident slab should fall back
    # to an additional M-tiled grid axis; not needed at caption-model sizes.
    out = pl.pallas_call(
        _linear_kernel,
        out_shape=jax.ShapeDtypeStruct((Mp, Np), out_dtype),
        grid=(Np // tn,),
        in_specs=[
            pl.BlockSpec((Mp, K), lambda j: (0, 0), pipeline_mode=pl.Buffered(1)),
            pl.BlockSpec((K, tn), lambda j: (0, j)),
            pl.BlockSpec((1, tn), lambda j: (0, j)),
        ],
        out_specs=pl.BlockSpec((Mp, tn), lambda j: (0, j)),
        compiler_params=pltpu.CompilerParams(
            dimension_semantics=("parallel",),
            vmem_limit_bytes=32 * 1024 * 1024,
        ),
    )(xp, wp, bp)
    return out[:M, :N]


# -----------------------------------------------------------------------------
# Recurrent kernel: stacked GRU cells, tt timesteps per grid step,
# grid = (batch_tiles [parallel], time_blocks [arbitrary]).
# -----------------------------------------------------------------------------

def make_gru_stack_kernel(num_layers, tt_block, hidden_p, seq_len, seq_len_padded):
    L, Hp = num_layers, hidden_p
    needs_mask = seq_len_padded != seq_len

    def kernel(*refs):
        xg0_ref = refs[0]       # [tt, bt, 3Hp] layer-0 x-side gate pre-acts (embeddings part)
        xcnn_ref = refs[1]      # [bt, 3Hp]     sequence-constant CNN term + gate biases
        h0_ref = refs[2]        # [L, bt, Hp]   initial hidden state
        wh0_zr_ref, wh0_c_ref = refs[3], refs[4]          # [Hp,2Hp], [Hp,Hp]
        idx = 5
        upper_refs = []
        for _ in range(1, L):
            upper_refs.append(refs[idx:idx + 3])          # (W_zr [2Hp,2Hp], W_c [2Hp,Hp], bias [1,3Hp])
            idx += 3
        hid_ref = refs[idx]     # [tt, bt, Hp]  top-layer output per step
        hfin_ref = refs[idx + 1]  # [L, bt, Hp] final hidden state
        h_scr = refs[idx + 2]   # VMEM [L, bt, Hp] carried across the time axis

        t_id = pl.program_id(1)

        @pl.when(t_id == 0)
        def _():
            h_scr[...] = h0_ref[...]

        # Loaded once per grid iteration (single-buffered constant-index inputs).
        wh0_zr = wh0_zr_ref[...]
        wh0_c = wh0_c_ref[...]
        upper = [tuple(r[...] for r in u) for u in upper_refs]
        xcnn = xcnn_ref[...]

        def mxu_dot(a, w):
            # MXU matmul with (optionally bf16) operands and f32 accumulation.
            return jnp.dot(a.astype(w.dtype), w, preferred_element_type=jnp.float32)

        # Hidden states carried as Python-local values across the unrolled loop;
        # the scratch is written back once per grid iteration.
        h = [h_scr[l] for l in range(L)]

        for ti in range(tt_block):
            if needs_mask:
                keep = (t_id * tt_block + ti < seq_len).astype(jnp.float32)

            # ---- layer 0: x-side gate pre-acts precomputed; add CNN term here.
            gx0 = xg0_ref[ti].astype(jnp.float32) + xcnn
            zr = jax.nn.sigmoid(gx0[:, : 2 * Hp] + mxu_dot(h[0], wh0_zr))
            z, r = zr[:, :Hp], zr[:, Hp:]
            c = jnp.tanh(gx0[:, 2 * Hp:] + mxu_dot(r * h[0], wh0_c))
            out = z * h[0] + (1.0 - z) * c
            if needs_mask:
                h[0] = keep * out + (1.0 - keep) * h[0]
            else:
                h[0] = out

            # ---- layers > 0: fused [x|h] matmuls (2 MXU ops per layer/step).
            for l in range(1, L):
                w_zr, w_c, bias = upper[l - 1]
                xh = jnp.concatenate([out, h[l]], axis=1)
                zr = jax.nn.sigmoid(mxu_dot(xh, w_zr) + bias[:, : 2 * Hp])
                z, r = zr[:, :Hp], zr[:, Hp:]
                xrh = jnp.concatenate([out, r * h[l]], axis=1)
                c = jnp.tanh(mxu_dot(xrh, w_c) + bias[:, 2 * Hp:])
                out = z * h[l] + (1.0 - z) * c
                if needs_mask:
                    h[l] = keep * out + (1.0 - keep) * h[l]
                else:
                    h[l] = out

            hid_ref[ti] = out.astype(hid_ref.dtype)

        for l in range(L):
            h_scr[l] = h[l]

        @pl.when(t_id == pl.num_programs(1) - 1)
        def _():
            for l in range(L):
                hfin_ref[l] = h[l]

    return kernel


# -----------------------------------------------------------------------------
# RNN forward (teacher forcing)
# -----------------------------------------------------------------------------

def rnn_forward_pallas(emb_tbe, pcnn, h0, cell_params, w_out, b_out, *,
                       matmul_dtype=jnp.float32, tt_cap=8, bt_cap=64,
                       vmem_budget_bytes=24 * 1024 * 1024):
    """emb_tbe:[T,B,E], pcnn:[B,C], h0:[L,B,H]; cell_params: list of
    (wu,bu,wr,br,wc,bc) with weights [input+H, H]; w_out:[H,V], b_out:[V].
    Returns (logits [B,T,V] f32, final hidden [L,B,H] f32)."""
    T, B, E = emb_tbe.shape
    L, _, H = h0.shape
    C = pcnn.shape[1]
    V = w_out.shape[1]
    f32 = jnp.float32
    mdt = matmul_dtype

    # Lane/sublane-dense padding (exact; see header comment).
    Hp = _round_up(H, 128)
    b_sub = 16 if mdt == jnp.bfloat16 else 8
    Bp = _round_up(B, b_sub)

    # ---- wrapper-side per-gate padding + weight fusion -----------------------
    wu0, bu0, wr0, br0, wc0, bc0 = cell_params[0]
    dx0 = E + C

    def colpad(w):
        return _pad2(w, w.shape[0], Hp)

    wx0_g = jnp.concatenate([colpad(wu0[:dx0]), colpad(wr0[:dx0]),
                             colpad(wc0[:dx0])], axis=1)                     # [E+C, 3Hp]
    b0_g = jnp.concatenate([_pad2(bu0, 1, Hp), _pad2(br0, 1, Hp),
                            _pad2(bc0, 1, Hp)], axis=1)                      # [1, 3Hp]
    wh0_zr = jnp.concatenate([_pad2(wu0[dx0:], Hp, Hp),
                              _pad2(wr0[dx0:], Hp, Hp)], axis=1)             # [Hp, 2Hp]
    wh0_c = _pad2(wc0[dx0:], Hp, Hp)                                         # [Hp, Hp]

    upper_params = []
    for (wu, bu, wr, br, wc, bc) in cell_params[1:]:
        wux, wuh = _pad2(wu[:H], Hp, Hp), _pad2(wu[H:], Hp, Hp)
        wrx, wrh = _pad2(wr[:H], Hp, Hp), _pad2(wr[H:], Hp, Hp)
        wcx, wch = _pad2(wc[:H], Hp, Hp), _pad2(wc[H:], Hp, Hp)
        w_zr = jnp.concatenate([jnp.concatenate([wux, wrx], axis=1),
                                jnp.concatenate([wuh, wrh], axis=1)], axis=0)  # [2Hp, 2Hp]
        w_c = jnp.concatenate([wcx, wch], axis=0)                              # [2Hp, Hp]
        bias = jnp.concatenate([_pad2(bu, 1, Hp), _pad2(br, 1, Hp),
                                _pad2(bc, 1, Hp)], axis=1)                     # [1, 3Hp]
        upper_params.append((w_zr.astype(mdt), w_c.astype(mdt), bias.astype(f32)))

    # ---- layer-0 x-side gate pre-activations precomputed over the sequence ---
    emb_p = jnp.pad(emb_tbe, ((0, 0), (0, Bp - B), (0, 0))) if Bp != B else emb_tbe
    xg_emb = linear_xresident(
        emb_p.reshape(T * Bp, E).astype(mdt), wx0_g[:E].astype(mdt),
        jnp.zeros((1, 3 * Hp), f32), out_dtype=mdt,
    ).reshape(T, Bp, 3 * Hp)
    xg_cnn = linear_xresident(pcnn.astype(mdt), wx0_g[E:].astype(mdt), b0_g)   # [B, 3Hp] f32
    if Bp != B:
        xg_cnn = jnp.pad(xg_cnn, ((0, Bp - B), (0, 0)))

    h0_p = jnp.pad(h0, ((0, 0), (0, Bp - B), (0, Hp - H))).astype(f32)

    # ---- tile sizes: batch tile bt (parallel axis) and time block tt ---------
    bt = max(b_sub, (min(Bp, bt_cap) // b_sub) * b_sub)
    while Bp % bt:
        bt -= b_sub

    itm = jnp.dtype(mdt).itemsize
    fixed = (
        (Hp * 2 * Hp + Hp * Hp) * itm                         # layer-0 h-side weights
        + (L - 1) * (2 * Hp * 2 * Hp + 2 * Hp * Hp) * itm     # fused upper-layer weights
        + (L - 1) * 3 * Hp * 4 + bt * 3 * Hp * 4              # biases + xg_cnn
        + 2 * L * bt * Hp * 4                                 # h0 + scratch
        + 2 * L * bt * Hp * 4                                 # hfin output buffers
    )
    per_tt = 2 * bt * 3 * Hp * itm + 2 * bt * Hp * itm        # xg in + hid out (x2 buffers)
    tt = int(max(1, min(tt_cap, (vmem_budget_bytes - fixed) // max(per_tt, 1), T)))
    Tp = _round_up(T, tt)                                     # pad T instead of shrinking tt
    if Tp != T:
        xg_emb = jnp.pad(xg_emb, ((0, Tp - T), (0, 0), (0, 0)))

    # ---- recurrent pallas_call ------------------------------------------------
    const = dict(pipeline_mode=pl.Buffered(1))                # single-buffer constants
    args = [xg_emb, xg_cnn, h0_p, wh0_zr.astype(mdt), wh0_c.astype(mdt)]
    in_specs = [
        pl.BlockSpec((tt, bt, 3 * Hp), lambda b, t: (t, b, 0)),
        pl.BlockSpec((bt, 3 * Hp), lambda b, t: (b, 0), **const),
        pl.BlockSpec((L, bt, Hp), lambda b, t: (0, b, 0), **const),
        pl.BlockSpec((Hp, 2 * Hp), lambda b, t: (0, 0), **const),
        pl.BlockSpec((Hp, Hp), lambda b, t: (0, 0), **const),
    ]
    for (w_zr, w_c, bias) in upper_params:
        args += [w_zr, w_c, bias]
        in_specs += [
            pl.BlockSpec((2 * Hp, 2 * Hp), lambda b, t: (0, 0), **const),
            pl.BlockSpec((2 * Hp, Hp), lambda b, t: (0, 0), **const),
            pl.BlockSpec((1, 3 * Hp), lambda b, t: (0, 0), **const),
        ]

    out_shape = (
        jax.ShapeDtypeStruct((Tp, Bp, Hp), mdt),    # top-layer output per step
        jax.ShapeDtypeStruct((L, Bp, Hp), f32),     # final hidden state
    )
    out_specs = (
        pl.BlockSpec((tt, bt, Hp), lambda b, t: (t, b, 0)),
        pl.BlockSpec((L, bt, Hp), lambda b, t: (0, b, 0)),
    )

    # TODO(synk): input_output_aliases={2: 1} could alias h0_p's HBM buffer with
    # the final-hidden output (small win); kept un-aliased for clarity.
    hid, h_final = pl.pallas_call(
        make_gru_stack_kernel(L, tt, Hp, T, Tp),
        out_shape=out_shape,
        grid=(Bp // bt, Tp // tt),
        in_specs=in_specs,
        out_specs=out_specs,
        scratch_shapes=[pltpu.VMEM((L, bt, Hp), f32)],
        compiler_params=pltpu.CompilerParams(
            dimension_semantics=("parallel", "arbitrary"),   # batch || , time sequential
            vmem_limit_bytes=32 * 1024 * 1024,               # safe on v5e/v6e/v7x
        ),
    )(*args)

    # ---- vocabulary projection: resident activations, W read once ------------
    w_out_p = jnp.pad(w_out, ((0, Hp - H), (0, 0))).astype(mdt)
    hid_use = hid[:T, :B].reshape(T * B, Hp)
    logits_flat = linear_xresident(hid_use, w_out_p, b_out)                  # [T*B, V] f32
    # TODO(synk): emit [B, T, Vpad] directly from the projection kernel to skip
    # this extra transpose pass over the largest tensor.
    logits = jnp.transpose(logits_flat.reshape(T, B, V), (1, 0, 2))          # [B, T, V]
    return logits, h_final[:, :B, :H]


# -----------------------------------------------------------------------------
# ImageCaptionModel.forward (training / teacher-forcing path)
# -----------------------------------------------------------------------------

def image_caption_forward_pallas(cnn_features, x_tokens, params,
                                 current_hidden_state=None,
                                 matmul_dtype=jnp.float32):
    B, T = x_tokens.shape
    H = params["hidden_state_size"]
    L = params["num_rnn_layers"]

    # input_layer + LeakyReLU(0.01).  nn.Dropout(0.25) is the identity in eval mode.
    # TODO(synk): training-mode dropout would need in-kernel PRNG (pltpu.prng_*).
    pcnn = linear_xresident(cnn_features.astype(matmul_dtype),
                            params["w_in"].astype(matmul_dtype), params["b_in"])
    pcnn = jnp.where(pcnn >= 0, pcnn, 0.01 * pcnn)                             # LeakyReLU

    # Embedding lookup (gather) in plain JAX, then time-major for the kernel.
    emb = params["emb_table"][x_tokens]                                        # [B, T, E]
    emb_tbe = jnp.transpose(emb, (1, 0, 2))                                    # [T, B, E]

    if current_hidden_state is None:
        h0 = jnp.zeros((L, B, H), jnp.float32)
    else:
        h0 = current_hidden_state

    # TODO(synk): is_train=False (greedy argmax feedback) needs a data-dependent
    # per-step embedding gather inside the recurrence; only teacher forcing here.
    return rnn_forward_pallas(emb_tbe, pcnn, h0, params["cells"],
                              params["w_out"], params["b_out"],
                              matmul_dtype=matmul_dtype)


# -----------------------------------------------------------------------------
# Pure-JAX reference of the PyTorch semantics (for verification)
# -----------------------------------------------------------------------------

def image_caption_forward_ref(cnn_features, x_tokens, params,
                              current_hidden_state=None):
    B, T = x_tokens.shape
    H = params["hidden_state_size"]
    L = params["num_rnn_layers"]
    pcnn = cnn_features @ params["w_in"] + params["b_in"].reshape(1, -1)
    pcnn = jnp.where(pcnn >= 0, pcnn, 0.01 * pcnn)
    emb = params["emb_table"][x_tokens]
    h = (current_hidden_state if current_hidden_state is not None
         else jnp.zeros((L, B, H), jnp.float32))
    logits = []
    for i in range(T):
        x = jnp.concatenate([emb[:, i, :], pcnn], axis=1)
        new_h = []
        for layer, (wu, bu, wr, br, wc, bc) in enumerate(params["cells"]):
            hl = h[layer]
            xh = jnp.concatenate([x, hl], axis=1)
            z = jax.nn.sigmoid(xh @ wu + bu)
            r = jax.nn.sigmoid(xh @ wr + br)
            hhat = jnp.tanh(jnp.concatenate([x, r * hl], axis=1) @ wc + bc)
            out = z * hl + (1.0 - z) * hhat
            new_h.append(out)
            x = out
        h = jnp.stack(new_h, axis=0)
        logits.append(x @ params["w_out"] + params["b_out"].reshape(1, -1))
    return jnp.stack(logits, axis=1), h


# -----------------------------------------------------------------------------
# Main
# -----------------------------------------------------------------------------

if __name__ == "__main__":
    # Small deterministic config.  The original module is only shape-consistent
    # when hidden_state_sizes == nn_map_size, so here nn_map_size == H.
    B, T = 8, 16
    E = 16            # embedding_size
    NCF = 24          # number_of_cnn_features
    H = 32            # hidden_state_sizes (== nn_map_size)
    L = 2             # num_rnn_layers
    V = 64            # vocabulary_size

    key = jax.random.PRNGKey(0)
    ks = iter(jax.random.split(key, 32))

    emb_table = jax.random.normal(next(ks), (V, E), jnp.float32) * 0.1
    w_in = jax.random.normal(next(ks), (NCF, H), jnp.float32) / jnp.sqrt(NCF)
    b_in = jax.random.normal(next(ks), (H,), jnp.float32) * 0.01
    w_out = jax.random.normal(next(ks), (H, V), jnp.float32) / jnp.sqrt(H)
    b_out = jax.random.normal(next(ks), (V,), jnp.float32) * 0.01

    cells = []
    for layer in range(L):
        in_sz = (E + H) if layer == 0 else H
        hp = in_sz + H
        scale = 1.0 / jnp.sqrt(jnp.float32(hp))
        wu = jax.random.normal(next(ks), (hp, H), jnp.float32) * scale
        wr = jax.random.normal(next(ks), (hp, H), jnp.float32) * scale
        wc = jax.random.normal(next(ks), (hp, H), jnp.float32) * scale
        bu = jnp.zeros((1, H), jnp.float32)
        br = jnp.zeros((1, H), jnp.float32)
        bc = jnp.zeros((1, H), jnp.float32)
        cells.append((wu, bu, wr, br, wc, bc))

    params = dict(emb_table=emb_table, w_in=w_in, b_in=b_in, w_out=w_out,
                  b_out=b_out, cells=cells, hidden_state_size=H,
                  num_rnn_layers=L)

    cnn_features = jax.random.normal(next(ks), (B, NCF), jnp.float32)
    x_tokens = jax.random.randint(next(ks), (B, T), 0, V, jnp.int32)
    h0 = jax.random.normal(next(ks), (L, B, H), jnp.float32) * 0.1

    logits_ref, h_ref = image_caption_forward_ref(cnn_features, x_tokens, params, h0)

    # ---- f32 path: exact structural verification -----------------------------
    logits, h_final = image_caption_forward_pallas(
        cnn_features, x_tokens, params, h0, matmul_dtype=jnp.float32)
    logits = jax.block_until_ready(logits)
    h_final = jax.block_until_ready(h_final)
    assert logits.shape == (B, T, V)
    assert h_final.shape == (L, B, H)
    assert jnp.allclose(logits, logits_ref, rtol=1e-4, atol=1e-4), \
        float(jnp.max(jnp.abs(logits - logits_ref)))
    assert jnp.allclose(h_final, h_ref, rtol=1e-4, atol=1e-4), \
        float(jnp.max(jnp.abs(h_final - h_ref)))

    # ---- bf16-matmul path (f32 accumulation/elementwise): loose check --------
    logits_bf, h_final_bf = image_caption_forward_pallas(
        cnn_features, x_tokens, params, h0, matmul_dtype=jnp.bfloat16)
    logits_bf = jax.block_until_ready(logits_bf)
    h_final_bf = jax.block_until_ready(h_final_bf)
    assert logits_bf.shape == (B, T, V)
    assert bool(jnp.all(jnp.isfinite(logits_bf)))
    assert jnp.allclose(logits_bf, logits_ref, rtol=1e-1, atol=1e-1), \
        float(jnp.max(jnp.abs(logits_bf - logits_ref)))
    assert jnp.allclose(h_final_bf, h_ref, rtol=1e-1, atol=1e-1), \
        float(jnp.max(jnp.abs(h_final_bf - h_ref)))

    print("KERNEL_OK")
</pallas_src>

<mosaic_0001>
module attributes {stable_mosaic.version = 11 : i64} {
  func.func @_linear_kernel(%arg0: i32, %arg1: memref<8x24xf32, #tpu.memory_space<vmem>>, %arg2: memref<24x128xf32, #tpu.memory_space<vmem>>, %arg3: memref<1x128xf32, #tpu.memory_space<vmem>>, %arg4: memref<8x128xf32, #tpu.memory_space<vmem>>) attributes {dimension_semantics = [#tpu.dimension_semantics<parallel>], iteration_bounds = array<i64: 1>, scalar_prefetch = 0 : i64, scratch_operands = 0 : i64, tpu.core_type = #tpu.core_type<tc>, window_params = [{pipeline_mode = #tpu.pipeline_mode<synchronous>, transform_indices = @transform_0, window_bounds = array<i64: 8, 24>}, {transform_indices = @transform_1, window_bounds = array<i64: 24, 128>}, {transform_indices = @transform_2, window_bounds = array<i64: 1, 128>}, {transform_indices = @transform_3, window_bounds = array<i64: 8, 128>}]} {
    %c0 = arith.constant 0 : index
    %c0_0 = arith.constant 0 : index
    %0 = vector.load %arg1[%c0, %c0_0] : memref<8x24xf32, #tpu.memory_space<vmem>>, vector<8x24xf32>
    %c0_1 = arith.constant 0 : index
    %c0_2 = arith.constant 0 : index
    %1 = vector.load %arg2[%c0_1, %c0_2] : memref<24x128xf32, #tpu.memory_space<vmem>>, vector<24x128xf32>
    %cst = arith.constant dense<0.000000e+00> : vector<8x128xf32>
    %2 = tpu.matmul %0, %1, %cst {dimension_numbers = #tpu.dot_dimension_numbers<[1], [0], [0], [1], [0, 0, 1, 1], [], []>} : vector<8x24xf32>, vector<24x128xf32>, vector<8x128xf32> -> vector<8x128xf32>
    %c0_3 = arith.constant 0 : index
    %c0_4 = arith.constant 0 : index
    %3 = vector.load %arg3[%c0_3, %c0_4] : memref<1x128xf32, #tpu.memory_space<vmem>>, vector<1x128xf32>
    %4 = vector.broadcast %3 : vector<1x128xf32> to vector<8x128xf32>
    %5 = arith.addf %2, %4 : vector<8x128xf32>
    %c0_5 = arith.constant 0 : index
    %c0_6 = arith.constant 0 : index
    %6 = vector.load %arg4[%c0_5, %c0_6] : memref<8x128xf32, #tpu.memory_space<vmem>>, vector<8x128xf32>
    tpu.vector_store %arg4[%c0_5, %c0_6], %5 {strides = array<i32>} : memref<8x128xf32, #tpu.memory_space<vmem>>, vector<8x128xf32>,
    return
  }
  func.func @transform_0(%arg0: i32) -> (i32, i32) {
    %c0_i32 = arith.constant 0 : i32
    %c0_i32_0 = arith.constant 0 : i32
    %c0_i32_1 = arith.constant 0 : i32
    return %c0_i32, %c0_i32_0 : i32, i32
  }
  func.func @transform_1(%arg0: i32) -> (i32, i32) {
    %c0_i32 = arith.constant 0 : i32
    %c0_i32_0 = arith.constant 0 : i32
    return %c0_i32, %arg0 : i32, i32
  }
  func.func @transform_2(%arg0: i32) -> (i32, i32) {
    %c0_i32 = arith.constant 0 : i32
    %c0_i32_0 = arith.constant 0 : i32
    return %c0_i32, %arg0 : i32, i32
  }
  func.func @transform_3(%arg0: i32) -> (i32, i32) {
    %c0_i32 = arith.constant 0 : i32
    %c0_i32_0 = arith.constant 0 : i32
    return %c0_i32, %arg0 : i32, i32
  }
}

</mosaic_0001>

<bundles_post_ra>
// kernel: tpu_custom_call.1
= control target key start
LH: loop header
LB: loop body
LE: loop exit
PB: predicated region body
PF: predicated region fallthrough
CT: control target
= control target key end

     0   :  { %8 = vsyncpa [#allocation3], 0  ;;  %s315_s0 = inlined_call_operand.hbm [shape: f32[8,24], index: 0, kind: input, shape index: {}]   ;;  %s316_s1 = inlined_call_operand.hbm [shape: f32[24,128], index: 1, kind: input, shape index: {}]   ;;  %s317_s2 = inlined_call_operand.vmem [shape: f32[1,128], index: 2, kind: input, shape index: {}]   ;;  %s318_s3 = inlined_call_operand.hbm [shape: f32[8,128], index: 3, kind: output, shape index: {}]  }
   0x1   :  { %9 = vsyncpa [#allocation6], 0 }
   0x2   :  { %10 = vsyncpa [#allocation4], 0  ;;  %s241_s12 = smov [#allocation2]   ;;  %s242_s14 = smov [#allocation5]  }
   0x3   :  { %s17_s13 = sshll.u32 %s241_s12, 4  ;;  %s26_s15 = sshll.u32 %s242_s14, 4  ;;  %s18_s13 = int_to_ptr.vmem [resolvable:$true] %s17_s13  ;;  %s269_s15 = int_to_ptr.vmem [resolvable:$true] %s26_s15 }
   0x4   :  { %s169_s18 = scalar_lea.hbm %s315_s0, 128 }
   0x5   :  { %p170_p0 = scmp.ne.s32.totalorder %s315_s0, %s169_s18  ;;  %p173_p1 = scmp.lt.u32.totalorder %s169_s18, %s315_s0 }
   0x7   :  { %p175_p2 = pnand %p173_p1, %p170_p0 }
   0x9   :  { %178 = shalt.err (!%p175_p2)
}
   0xa   :  { %s179_s23 = scalar_lea.vmem %s18_s13, 128  ;;  %p184_p4 = scmp.lt.s32.totalorder %s18_s13, %s18_s13 }
   0xb   :  { %p180_p3 = scmp.ne.s32.totalorder %s18_s13, %s179_s23  ;;  %p185_p5 = scmp.lt.s32.totalorder %s179_s23, %s179_s23 }
   0xd   :  { %p186_p6 = por %p185_p5, %p184_p4 }
   0xf   :  { %p187_p7 = pnand %p186_p6, %p180_p3 }
  0x11   :  { %190 = shalt.err (!%p187_p7)
}
  0x12   :  { %20 = dma.hbm_to_vmem [thread:$0]  %s315_s0, 128, %s18_s13, [#allocation3]  }
  0x13   :  { %s191_s28 = scalar_lea.hbm %s316_s1, 384 }
  0x14   :  { %p192_p8 = scmp.ne.s32.totalorder %s316_s1, %s191_s28  ;;  %p195_p9 = scmp.lt.u32.totalorder %s191_s28, %s316_s1 }
  0x16   :  { %p197_p10 = pnand %p195_p9, %p192_p8 }
  0x18   :  { %200 = shalt.err (!%p197_p10)
}
  0x19   :  { %s201_s6 = scalar_lea.vmem %s269_s15, 384  ;;  %p206_p12 = scmp.lt.s32.totalorder %s269_s15, %s269_s15 }
  0x1a   :  { %p202_p11 = scmp.ne.s32.totalorder %s269_s15, %s201_s6  ;;  %p207_p13 = scmp.lt.s32.totalorder %s201_s6, %s201_s6 }
  0x1c   :  { %p208_p0 = por %p207_p13, %p206_p12 }
  0x1e   :  { %p209_p1 = pnand %p208_p0, %p202_p11 }
  0x20   :  { %212 = shalt.err (!%p209_p1)
}
  0x21   :  { %s243_s0 = smov 128   ;;  %s244_s7 = smov 8  }
  0x22   :  { %32 = dma.hbm_to_vmem [thread:$0]  %s316_s1, 384, %s269_s15, [#allocation6], %s243_s0, %s243_s0, %s244_s7  }
  0x23   :  { %235 = dma.done.wait [#allocation3], 128  }
  0x24   :  { %236 = vsyncadd [#allocation3], 4294967168 }
  0x25   :  { %237 = dma.done.wait [#allocation6], 384  }
  0x26   :  { %238 = vsyncadd [#allocation6], 4294966912  ;;  %v245_v0 = vmov 0.0|0.0   ;;  %vm246_vm0 = vmmov 0   ;;  %v247_v1 = vmov 0.0   ;;  %v42_v2 = vld [vmem:[#allocation5] sm:$0xff] }
  0x27   :  { %158 = vmatprep.subr.bf16.mxu0 %v245_v0  ;;  %155 = vmatprep.mubr.msk.f32.mxu0 %vm246_vm0, %v247_v1  ;;  %v43_v3 = vld [vmem:[#allocation5 + $0x8] sm:$0xff]  ;;  %v44_v5 = vld [vmem:[#allocation5 + $0x10] sm:$0xff]  ;;  %v41_v6 = vld [vmem:[#allocation2] sm:$0xff]  ;;  %vm52_vm1 = vcmask 195584   ;;  %s248_s11 = smov [#allocation7]  }
  0x28   :  { %v159_v4 = vpack.c.bf16 %v43_v3, %v42_v2  ;;  %v143_v7 = vld [vmem:[%s317_s2] ss:$0 sm:$0xff]  ;;  %s133_s12 = sshll.u32 %s248_s11, 4  ;;  %s134_s12 = int_to_ptr.vmem [resolvable:$true] %s133_s12 }
  0x29   :  { %s213_s13 = scalar_lea.vmem %s134_s12, 128  ;;  %p218_p3 = scmp.lt.s32.totalorder %s134_s12, %s134_s12 }
  0x2a   :  { %160 = vmatpush3.bf16.msra.mxu0 %v159_v4  ;;  %p214_p2 = scmp.ne.s32.totalorder %s134_s12, %s213_s13  ;;  %p219_p4 = scmp.lt.s32.totalorder %s213_s13, %s213_s13 }
  0x2b   :  { %153 = vmatprep.subr.mxu0 %v247_v1 }
  0x2c   :  { %p220_p5 = por %p219_p4, %p218_p3 }
  0x2e   :  { %154 = vmatpush3.msra.mxu0 %v44_v5  ;;  %p221_p6 = pnand %p220_p5, %p214_p2 }
  0x2f   :  { %156 = vmatmul.mubr.msk.f32.vlgmr.msra.gmra.mrb[0].mxu0 %vm52_vm1, %v41_v6 }
 0x102   :  { %v122_v8 = vpop.f32.mrb[0].mxu0 }
 0x103   :  { %v123_v9 = vadd.f32 %v143_v7, %v122_v8  ;;  %v157_v10 = vpop.f32.mrb[1].mxu0 }
 0x105   :  { %126 = vst [vmem:[#allocation7] sm:$0xff] %v123_v9 }
 0x106   :  { %224 = shalt.err (!%p221_p6)
}
 0x107   :  { %s225_s16 = scalar_lea.hbm %s318_s3, 128 }
 0x108   :  { %p226_p7 = scmp.ne.s32.totalorder %s318_s3, %s225_s16  ;;  %p229_p8 = scmp.lt.u32.totalorder %s225_s16, %s318_s3 }
 0x10a   :  { %p231_p9 = pnand %p229_p8, %p226_p7 }
 0x10c   :  { %234 = shalt.err (!%p231_p9)
}
 0x10d   :  { %136 = dma.vmem_to_hbm [thread:$0]  %s134_s12, 128, %s318_s3, [#allocation4]  }
 0x10e   :  { %239 = dma.done.wait [#allocation4], 128  }
 0x10f   :  { %240 = vsyncadd [#allocation4], 4294967168 }
 0x110   :  { %140 = vsyncpa [#allocation3], 1 }
 0x111   :  { %141 = vsyncpa [#allocation6], 1 }
 0x112   :  { %142 = vsyncpa [#allocation4], 1 }

</bundles_post_ra>
